<compile_context>
chip_gen: v5e
topology: v5e:2x2
jax: 0.10.0
libtpu: 0.0.40
codegen_flags: <defaults>
</compile_context>

<pallas_src>
import jax
import jax.numpy as jnp
from jax.experimental import pallas as pl
from jax.experimental.pallas import tpu as pltpu


def _round_up(x, m):
    return (x + m - 1) // m * m


# ----------------------------------------------------------------------------
# Fused classifier kernel: out = relu(x @ W1 + b1) @ W2 + b2
# ----------------------------------------------------------------------------
def _classifier_kernel(x_ref, w1_ref, b1_ref, w2_ref, b2_ref, out_ref):
    # fc1 -> relu  (hidden stays in VMEM/vregs, never touches HBM)
    h = jnp.dot(x_ref[...], w1_ref[...], preferred_element_type=jnp.float32)
    h = jnp.maximum(h + b1_ref[...], 0.0)
    # TODO(synk): nn.Dropout is identity in eval mode; training-mode random
    # masking (pltpu.prng_*) is not implemented.
    y = jnp.dot(h, w2_ref[...], preferred_element_type=jnp.float32)  # (TM, Cp)
    c = out_ref.shape[-1]
    # Store only the C useful lanes (masked vst) -> unpadded HBM writeback.
    out_ref[...] = y[:, :c] + b2_ref[...]


# ----------------------------------------------------------------------------
# One-time parameter preparation (hoisted out of the forward hot path).
# ----------------------------------------------------------------------------
def prepare_params(params):
    """Pad hidden dim to a lane-dense multiple of 128, once, at init.

    params: (w1, b1, w2, b2) with w1:(F,H), b1:(H,), w2:(H,C), b2:(C,)
            (Linear weights pre-transposed to (in_features, out_features))
    returns (w1_p:(F,Hp), b1_p:(1,Hp), w2_p:(Hp,Cp), b2_p:(1,C))
    """
    w1, b1, w2, b2 = params
    F, H = w1.shape
    C = w2.shape[1]
    Hp = _round_up(H, 128)
    Cp = _round_up(C, 128)
    w1_p = jnp.zeros((F, Hp), jnp.float32).at[:, :H].set(w1.astype(jnp.float32))
    b1_p = jnp.zeros((1, Hp), jnp.float32).at[0, :H].set(b1.astype(jnp.float32))
    w2_p = jnp.zeros((Hp, Cp), jnp.float32).at[:H, :C].set(w2.astype(jnp.float32))
    b2_p = b2.astype(jnp.float32).reshape(1, C)  # output is unpadded in C
    return w1_p, b1_p, w2_p, b2_p


def _choose_tm(n, block_rows):
    """Row tile: multiple of 8, <= block_rows, and >= 2 grid blocks when
    n > 8 so the 'parallel' batch axis feeds both v7x TensorCores."""
    tm = min(block_rows, _round_up(max(n, 1), 8))
    if n > 8:
        tm = min(tm, _round_up((n + 1) // 2, 8))
    return max(tm, 8)


def classifier_simple_forward(x, prepared_params, *, block_rows=512):
    """ClassifierSimple forward pass.

    x:               (N, num_feats) float32
    prepared_params: output of prepare_params()
    returns          (N, num_class) float32
    """
    w1_p, b1_p, w2_p, b2_p = prepared_params
    N, F = x.shape
    Hp = w1_p.shape[1]
    Cp = w2_p.shape[1]
    C = b2_p.shape[1]

    TM = _choose_tm(N, block_rows)
    grid = (pl.cdiv(N, TM),)  # tail block (if any) is masked by Pallas

    return pl.pallas_call(
        _classifier_kernel,
        out_shape=jax.ShapeDtypeStruct((N, C), jnp.float32),
        grid=grid,
        in_specs=[
            pl.BlockSpec((TM, F), lambda i: (i, 0)),    # x row tile
            pl.BlockSpec((F, Hp), lambda i: (0, 0)),    # w1 (resident)
            pl.BlockSpec((1, Hp), lambda i: (0, 0)),    # b1
            pl.BlockSpec((Hp, Cp), lambda i: (0, 0)),   # w2 (resident)
            pl.BlockSpec((1, C), lambda i: (0, 0)),     # b2
        ],
        out_specs=pl.BlockSpec((TM, C), lambda i: (i, 0)),
        compiler_params=pltpu.CompilerParams(
            dimension_semantics=("parallel",)),
    )(x.astype(jnp.float32), w1_p, b1_p, w2_p, b2_p)


def init_params(key, num_feats, num_hid, num_class):
    k1, k2, k3, k4 = jax.random.split(key, 4)
    w1 = jax.random.normal(k1, (num_feats, num_hid), jnp.float32) / jnp.sqrt(num_feats)
    b1 = jax.random.normal(k2, (num_hid,), jnp.float32) * 0.01
    w2 = jax.random.normal(k3, (num_hid, num_class), jnp.float32) / jnp.sqrt(num_hid)
    b2 = jax.random.normal(k4, (num_class,), jnp.float32) * 0.01
    return w1, b1, w2, b2


if __name__ == "__main__":
    # Small shapes implied by the forward: x (batch, num_feats)
    N, num_feats, num_hid, num_class = 16, 32, 16, 8

    key = jax.random.PRNGKey(0)
    k_in, k_par = jax.random.split(key)
    x = jax.random.normal(k_in, (N, num_feats), jnp.float32)
    params = init_params(k_par, num_feats, num_hid, num_class)

    # Padding is done once here, NOT per forward call.
    prepared = prepare_params(params)

    fwd = jax.jit(classifier_simple_forward)
    out = jax.block_until_ready(fwd(x, prepared))
    assert out.shape == (N, num_class), out.shape

    # Plain-JAX reference (dropout is identity in eval mode).
    w1, b1, w2, b2 = params
    ref = jnp.maximum(x @ w1 + b1, 0.0) @ w2 + b2
    assert jnp.allclose(out, ref, atol=1e-2, rtol=1e-2), float(
        jnp.max(jnp.abs(out - ref)))

    print("KERNEL_OK")
</pallas_src>

<mosaic_0001>
module attributes {stable_mosaic.version = 11 : i64} {
  func.func @_classifier_kernel(%arg0: i32, %arg1: memref<8x32xf32, #tpu.memory_space<vmem>>, %arg2: memref<32x128xf32, #tpu.memory_space<vmem>>, %arg3: memref<1x128xf32, #tpu.memory_space<vmem>>, %arg4: memref<128x128xf32, #tpu.memory_space<vmem>>, %arg5: memref<1x8xf32, #tpu.memory_space<vmem>>, %arg6: memref<8x8xf32, #tpu.memory_space<vmem>>) attributes {dimension_semantics = [#tpu.dimension_semantics<parallel>], iteration_bounds = array<i64: 2>, scalar_prefetch = 0 : i64, scratch_operands = 0 : i64, tpu.core_type = #tpu.core_type<tc>, window_params = [{transform_indices = @transform_0, window_bounds = array<i64: 8, 32>}, {pipeline_mode = #tpu.pipeline_mode<synchronous>, transform_indices = @transform_1, window_bounds = array<i64: 32, 128>}, {pipeline_mode = #tpu.pipeline_mode<synchronous>, transform_indices = @transform_2, window_bounds = array<i64: 1, 128>}, {pipeline_mode = #tpu.pipeline_mode<synchronous>, transform_indices = @transform_3, window_bounds = array<i64: 128, 128>}, {pipeline_mode = #tpu.pipeline_mode<synchronous>, transform_indices = @transform_4, window_bounds = array<i64: 1, 8>}, {transform_indices = @transform_5, window_bounds = array<i64: 8, 8>}]} {
    %c0 = arith.constant 0 : index
    %c0_0 = arith.constant 0 : index
    %0 = vector.load %arg1[%c0, %c0_0] : memref<8x32xf32, #tpu.memory_space<vmem>>, vector<8x32xf32>
    %c0_1 = arith.constant 0 : index
    %c0_2 = arith.constant 0 : index
    %1 = vector.load %arg2[%c0_1, %c0_2] : memref<32x128xf32, #tpu.memory_space<vmem>>, vector<32x128xf32>
    %cst = arith.constant dense<0.000000e+00> : vector<8x128xf32>
    %2 = tpu.matmul %0, %1, %cst {dimension_numbers = #tpu.dot_dimension_numbers<[1], [0], [0], [1], [0, 0, 1, 1], [], []>} : vector<8x32xf32>, vector<32x128xf32>, vector<8x128xf32> -> vector<8x128xf32>
    %c0_3 = arith.constant 0 : index
    %c0_4 = arith.constant 0 : index
    %3 = vector.load %arg3[%c0_3, %c0_4] : memref<1x128xf32, #tpu.memory_space<vmem>>, vector<1x128xf32>
    %4 = vector.broadcast %3 : vector<1x128xf32> to vector<8x128xf32>
    %5 = arith.addf %2, %4 : vector<8x128xf32>
    %cst_5 = arith.constant 0.000000e+00 : f32
    %6 = vector.broadcast %cst_5 : f32 to vector<8x128xf32>
    %7 = arith.maximumf %5, %6 : vector<8x128xf32>
    %c0_6 = arith.constant 0 : index
    %c0_7 = arith.constant 0 : index
    %8 = vector.load %arg4[%c0_6, %c0_7] : memref<128x128xf32, #tpu.memory_space<vmem>>, vector<128x128xf32>
    %cst_8 = arith.constant dense<0.000000e+00> : vector<8x128xf32>
    %9 = tpu.matmul %7, %8, %cst_8 {dimension_numbers = #tpu.dot_dimension_numbers<[1], [0], [0], [1], [0, 0, 1, 1], [], []>} : vector<8x128xf32>, vector<128x128xf32>, vector<8x128xf32> -> vector<8x128xf32>
    %10 = vector.extract_strided_slice %9 {offsets = [0, 0], sizes = [8, 8], strides = [1, 1]} : vector<8x128xf32> to vector<8x8xf32>
    %c0_9 = arith.constant 0 : index
    %c0_10 = arith.constant 0 : index
    %11 = vector.load %arg5[%c0_9, %c0_10] : memref<1x8xf32, #tpu.memory_space<vmem>>, vector<1x8xf32>
    %12 = vector.broadcast %11 : vector<1x8xf32> to vector<8x8xf32>
    %13 = arith.addf %10, %12 : vector<8x8xf32>
    %c0_11 = arith.constant 0 : index
    %c0_12 = arith.constant 0 : index
    %14 = vector.load %arg6[%c0_11, %c0_12] : memref<8x8xf32, #tpu.memory_space<vmem>>, vector<8x8xf32>
    tpu.vector_store %arg6[%c0_11, %c0_12], %13 {strides = array<i32>} : memref<8x8xf32, #tpu.memory_space<vmem>>, vector<8x8xf32>,
    return
  }
  func.func @transform_0(%arg0: i32) -> (i32, i32) {
    %c0_i32 = arith.constant 0 : i32
    %c0_i32_0 = arith.constant 0 : i32
    return %arg0, %c0_i32 : i32, i32
  }
  func.func @transform_1(%arg0: i32) -> (i32, i32) {
    %c0_i32 = arith.constant 0 : i32
    %c0_i32_0 = arith.constant 0 : i32
    %c0_i32_1 = arith.constant 0 : i32
    return %c0_i32, %c0_i32_0 : i32, i32
  }
  func.func @transform_2(%arg0: i32) -> (i32, i32) {
    %c0_i32 = arith.constant 0 : i32
    %c0_i32_0 = arith.constant 0 : i32
    %c0_i32_1 = arith.constant 0 : i32
    return %c0_i32, %c0_i32_0 : i32, i32
  }
  func.func @transform_3(%arg0: i32) -> (i32, i32) {
    %c0_i32 = arith.constant 0 : i32
    %c0_i32_0 = arith.constant 0 : i32
    %c0_i32_1 = arith.constant 0 : i32
    return %c0_i32, %c0_i32_0 : i32, i32
  }
  func.func @transform_4(%arg0: i32) -> (i32, i32) {
    %c0_i32 = arith.constant 0 : i32
    %c0_i32_0 = arith.constant 0 : i32
    %c0_i32_1 = arith.constant 0 : i32
    return %c0_i32, %c0_i32_0 : i32, i32
  }
  func.func @transform_5(%arg0: i32) -> (i32, i32) {
    %c0_i32 = arith.constant 0 : i32
    %c0_i32_0 = arith.constant 0 : i32
    return %arg0, %c0_i32 : i32, i32
  }
}

</mosaic_0001>

<bundles_post_ra>
// kernel: classifier_simple_forward.1
= control target key start
LH: loop header
LB: loop body
LE: loop exit
PB: predicated region body
PF: predicated region fallthrough
CT: control target
= control target key end

     0   :  { %10 = vsyncpa [#allocation3], 0  ;;  %s794_s0 = inlined_call_operand.hbm [shape: f32[16,32], index: 0, kind: input, shape index: {}]   ;;  %s795_s1 = inlined_call_operand.hbm [shape: f32[32,128], index: 1, kind: input, shape index: {}]   ;;  %s796_s2 = inlined_call_operand.vmem [shape: f32[1,128], index: 2, kind: input, shape index: {}]   ;;  %s797_s3 = inlined_call_operand.hbm [shape: f32[128,128], index: 3, kind: input, shape index: {}]   ;;  %s798_s4 = inlined_call_operand.vmem [shape: f32[1,8], index: 4, kind: input, shape index: {}]   ;;  %s799_s5 = inlined_call_operand.vmem [shape: f32[16,8], index: 5, kind: output, shape index: {}]  }
   0x1   :  { %12 = vsyncpa [#allocation3 + $0x1], 0 }
   0x2   :  { %13 = vsyncpa [#allocation5], 0  ;;  %s679_s18 = smov 0   ;;  %s681_s19 = smov 0  }
   0x3   :  { %s683_s20 = smov 0   ;;  %s685_s21 = smov 0  }
   0x4 LB: > { %s171_s24 = sshll.u32 %s795_s1, 4  ;;  %s703_s25 = sadd.s32 4294967295, %s643_s21   ;;  %s643_s21 = sphi %s685_s21, %s806_s21   ;;  %s639_s20 = sphi %s683_s20, %s805_s20   ;;  %s635_s19 = sphi %s681_s19, %s804_s19   ;;  %s631_s18 = sphi %s679_s18, %s803_s18   ;;  %s172_s24 = int_to_ptr.hbm [resolvable:$true] %s171_s24 }
   0x5   : > { %p437_p0 = scmp.ge.s32.totalorder %s643_s21, 1  ;;  %p40_p1 = scmp.eq.s32.totalorder %s703_s25, 0 }
   0x6   : > { %p160_p2 = scmp.lt.s32.totalorder %s643_s21, 3  ;;  %s645_s27 = smov [#allocation4]  }
   0x7   : > { %s173_s28 = sshll.u32 %s645_s27, 4  ;;  %s188_s6 = sshll.u32 %s797_s3, 4  ;;  %s174_s28 = int_to_ptr.vmem [resolvable:$true] %s173_s28  ;;  %s189_s6 = int_to_ptr.hbm [resolvable:$true] %s188_s6 }
   0x8   : > { %p708_p3 = pnand %p437_p0, %p160_p2  ;;  %s646_s7 = smov [#allocation6]  }
   0x9   : > { %s190_s8 = sshll.u32 %s646_s7, 4  ;;  %s647_s9 = smov 128   ;;  %s191_s8 = int_to_ptr.vmem [resolvable:$true] %s190_s8 }
   0xa   : > { %p461_p4 = pneg %p708_p3  ;;  %s648_s10 = smov 8  }
   0xb   : > { %s720_s11 = sadd.s32 1, %s643_s21   ;;  %s26_s13 = sadd.s32 1, %s639_s20 }
   0xc   : > { %p462_p5 = pnand %p461_p4, %p40_p1  ;;  %s23_s12 = ssub.s32 %s643_s21, %s720_s11 }
   0xd   : > { %p24_p6 = scmp.eq.s32.totalorder %s23_s12, 0  ;;  %p33_p7 = scmp.ne.s32.totalorder %s639_s20, %s635_s19 }
   0xe   : > { %464 = dma.hbm_to_vmem [thread:$0]  (!%p462_p5), %s172_s24, 512, %s174_s28, [#allocation5], %s647_s9, %s647_s9, %s648_s10  }
   0xf   : > { %467 = dma.hbm_to_vmem [thread:$0]  (!%p462_p5), %s189_s6, 2048, %s191_s8, [#allocation5], %s647_s9, %s647_s9, %s648_s10  }
  0x10   : > { %p34_p8 = scmp.eq.s32.totalorder %s643_s21, 0  ;;  %p39_p9 = scmp.ne.s32.totalorder %s635_s19, %s631_s18 }
  0x11   : > { %s731_s14 = scalar_select %p24_p6, %s639_s20, %s26_s13  }
  0x12   : > { %p735_p10 = por %p40_p1, %p39_p9  ;;  %p474_p11 = scmp.lt.s32.totalorder %s643_s21, 2 }
  0x13   : > { %s207_s16 = sand.u32 1, %s639_s20   ;;  %s442_s17 = sshll.u32 %s643_s21, 3 }
  0x14   : > { %p35_p12 = por %p34_p8, %p33_p7  ;;  %s441_s22 = sshll.u32 %s207_s16, 3 }
  0x15   : > { %s215_s27 = scalar_lea.hbm %s794_s0, %s442_s17  ;;  %s211_s29 = scalar_lea.vmem [#allocation2], %s441_s22 }
  0x16   : > { %s217_s28 = sshll.u32 %s215_s27, 4  ;;  %s219_s30 = sshll.u32 %s211_s29, 4  ;;  %s218_s28 = int_to_ptr.hbm [resolvable:$true] %s217_s28  ;;  %s220_s30 = int_to_ptr.vmem [resolvable:$true] %s219_s30 }
  0x17   : > { %p745_p13 = pnand %p474_p11, %p35_p12  ;;  %s208_s6 = scalar_lea.sflag [#allocation3], %s207_s16 }
  0x18   : > { %s575_s7 = sshra.s32 %s218_s28, 4  ;;  %s582_s10 = scalar_lea.hbm %s794_s0, 16  ;;  %s576_s7 = int_to_ptr.hbm [resolvable:$true] %s575_s7 }
  0x19   : > { %s577_s21 = scalar_lea.hbm %s576_s7, 8  ;;  %p579_p2 = pneg %p745_p13 }
  0x1a   : > { %p578_p0 = scmp.ne.s32.totalorder %s576_s7, %s577_s21  ;;  %p583_p6 = scmp.lt.s32.totalorder %s576_s7, %s794_s0 }
  0x1b   : > { %p584_p7 = scmp.lt.s32.totalorder %s582_s10, %s577_s21 }
  0x1c   : > { %p580_p4 = pnand %p579_p2, %p578_p0 }
  0x1d   : > { %p585_p8 = por %p584_p7, %p583_p6 }
  0x1e   : > { %p581_p5 = pneg %p580_p4 }
  0x20   : > { %p586_p9 = pnand %p585_p8, %p581_p5 }
  0x22   : > { %589 = shalt.err (!%p586_p9)
}
  0x23   : > { %471 = dma.hbm_to_vmem [thread:$0]  (!%p745_p13), %s218_s28, 128, %s220_s30, %s208_s6  }
  0x24   : > { %228 = sbr.rel (%p708_p3) target bundleno = 311 (0x137), region = 40  ;;  %s230_s16 = sand.u32 (!%p708_p3), 1, %s635_s19  }
  0x25   : > { %s444_s17 = sshll.u32 (!%p708_p3), %s230_s16, 3  ;;  %s231_s22 = scalar_lea.sflag (!%p708_p3), [#allocation3], %s230_s16 }
  0x26   : > { %s234_s23 = scalar_lea.vmem (!%p708_p3), [#allocation2], %s444_s17 }
  0x29   : > { %622 = dma.done.wait (%p735_p10), %s231_s22, 128  }
  0x2a   : > { %624 = vsyncadd (%p735_p10), %s231_s22, 4294967168 }
  0x2b   : > { %626 = dma.done.wait (%p40_p1), [#allocation5], 2560  }
  0x2c   : > { %628 = vsyncadd (%p40_p1), [#allocation5], 4294964736  ;;  %v279_v0 = vld [vmem:[#allocation4 + $0x18] sm:$0xff]  ;;  %v278_v1 = vld [vmem:[#allocation4 + $0x10] sm:$0xff]  ;;  %vm284_vm0 = vcmask 261120   ;;  %p271_p1 = scmp.lt.s32.totalorder %s703_s25, 1 }
  0x2d   : > { %300 = vmatpush.msra.mxu0 %v279_v0  ;;  %v324_v2 = vld [vmem:[#allocation6 + $0x78] sm:$0xff]  ;;  %v277_v3 = vld [vmem:[#allocation4 + $0x8] sm:$0xff]  ;;  %v323_v4 = vld [vmem:[#allocation6 + $0x70] sm:$0xff]  ;;  %vm350_vm1 = vcmask 64512  }
  0x2e   : > { %325 = vmatpush.msra.mxu1 %v324_v2  ;;  %v322_v5 = vld [vmem:[#allocation6 + $0x68] sm:$0xff]  ;;  %v276_v6 = vld [vmem:[#allocation4] sm:$0xff]  ;;  %v275_v7 = vld [vmem:[%s234_s23] sm:$0xff]  ;;  %s808_s25 = smov (!%p271_p1, %s703_s25), 1 }
  0x2f   : > { %301 = vmatpush.msra.mxu0 %v278_v1  ;;  %v321_v8 = vld [vmem:[#allocation6 + $0x60] sm:$0xff]  ;;  %v320_v9 = vld [vmem:[#allocation6 + $0x58] sm:$0xff]  ;;  %v319_v10 = vld [vmem:[#allocation6 + $0x50] sm:$0xff]  ;;  %s447_s24 = sshll.u32 %s808_s25, 3 }
  0x30   : > { %326 = vmatpush.msra.mxu1 %v323_v4  ;;  %v318_v11 = vld [vmem:[#allocation6 + $0x48] sm:$0xff]  ;;  %v317_v12 = vld [vmem:[#allocation6 + $0x40] sm:$0xff]  ;;  %v316_v13 = vld [vmem:[#allocation6 + $0x38] sm:$0xff]  ;;  %s274_s18 = scalar_lea.vmem %s799_s5, %s447_s24 }
  0x31   : > { %302 = vmatpush.msra.mxu0 %v277_v3  ;;  %v315_v14 = vld [vmem:[#allocation6 + $0x30] sm:$0xff]  ;;  %v314_v15 = vld [vmem:[#allocation6 + $0x28] sm:$0xff]  ;;  %v313_v16 = vld [vmem:[#allocation6 + $0x20] sm:$0xff] }
  0x32   : > { %327 = vmatpush.msra.mxu1 %v322_v5  ;;  %v312_v17 = vld [vmem:[#allocation6 + $0x18] sm:$0xff]  ;;  %v311_v18 = vld [vmem:[#allocation6 + $0x10] sm:$0xff]  ;;  %v310_v19 = vld [vmem:[#allocation6 + $0x8] sm:$0xff] }
  0x33   : > { %303 = vmatpush.msra.mxu0 %v276_v6  ;;  %v309_v20 = vld [vmem:[#allocation6] sm:$0xff]  ;;  %v513_v21 = vld [vmem:[%s796_s2] ss:$0 sm:$0xff] }
  0x34   : > { %448 = vmatmul.msk.f32.vlgmr.msra.gmra.mxu0 %vm284_vm0, %v275_v7  ;;  %328 = vmatpush.msra.mxu1 %v321_v8  ;;  %v514_v25 = vld [vmem:[%s798_s4] ss:$0 sm:$0xff] }
  0x36   : > { %329 = vmatpush.msra.mxu1 %v320_v9 }
  0x38   : > { %330 = vmatpush.msra.mxu1 %v319_v10 }
  0x3a   : > { %331 = vmatpush.msra.mxu1 %v318_v11 }
  0x3c   : > { %332 = vmatpush.msra.mxu1 %v317_v12 }
  0x3e   : > { %333 = vmatpush.msra.mxu1 %v316_v13 }
  0x40   : > { %334 = vmatpush.msra.mxu1 %v315_v14 }
  0x42   : > { %335 = vmatpush.msra.mxu1 %v314_v15 }
  0x44   : > { %336 = vmatpush.msra.mxu1 %v313_v16 }
  0x46   : > { %337 = vmatpush.msra.mxu1 %v312_v17 }
  0x48   : > { %338 = vmatpush.msra.mxu1 %v311_v18 }
  0x4a   : > { %339 = vmatpush.msra.mxu1 %v310_v19 }
  0x4c   : > { %340 = vmatpush.msra.mxu1 %v309_v20 }
  0xb1   : > { %v305_v22 = vpop.f32.mrf.mxu0 }
  0xb2   : > { %v306_v23 = vadd.f32 %v513_v21, %v305_v22 }
  0xb4   : > { %v308_v24 = vmax.f32 %v306_v23, 0.0 }
  0xb6   : > { %341 = vmatmul.f32.vlgmr.msra.gmra.mxu1 %v308_v24 }
 0x133   : > { %v342_v26 = vpop.f32.mrf.mxu1 }
 0x134   : > { %v349_v27 = vadd.f32 %v514_v25, %v342_v26 }
 0x136   : > { %351 = vst.msk [vmem:[%s274_s18] sm:$0xff] %vm350_vm1, %v349_v27 }
 0x137 PF: > { %p16_p3 = scmp.ge.s32.totalorder %s720_s11, 4   ;;  %s803_s18 = smov %s635_s19 }
 0x138   : > { %s804_s19 = smov %s639_s20  ;;  %s805_s20 = smov %s731_s14 }
 0x139   : > { %s806_s21 = smov %s720_s11  ;;  %18 = sbr.rel (!%p16_p3) target bundleno = 4 (0x4), region = 88 }
 0x13e   :  { %371 = vsyncpa [#allocation3], 1 }
 0x13f   :  { %373 = vsyncpa [#allocation3 + $0x1], 1 }
 0x140   :  { %374 = vsyncpa [#allocation5], 1 }

</bundles_post_ra>
